<compile_context>
chip_gen: v7x
topology: tpu7x:2x2x1
jax: 0.10.0
libtpu: 0.0.40
codegen_flags: <defaults>
</compile_context>

<pallas_src>
import functools

import jax
import jax.numpy as jnp
from jax.experimental import pallas as pl
from jax.experimental.pallas import tpu as pltpu


# --------------------------- generation-aware tiling --------------------------

def _vmem_limit_bytes():
    """~75% of physical per-core VMEM (≈48 MiB v7x, ≈96 MiB v5e/v6e)."""
    try:
        cap = int(getattr(pltpu.get_tpu_info(), "vmem_capacity_bytes", 0))
        if cap > 0:
            return (cap * 3) // 4
    except Exception:            # non-TPU backend / older jax: safe default
        pass
    return 48 * 1024 * 1024


_VMEM_LIMIT = _vmem_limit_bytes()
_SMALL_VMEM = _VMEM_LIMIT <= 56 * 1024 * 1024        # v7x-class (64 MiB physical)

if _SMALL_VMEM:                                      # v7x: keep tiles modest
    _MM_ROW_TILES = (256, 128, 64, 32, 16, 8)
    _LANE_TILES = (256, 128)
    _K_TILES = (512, 256, 128)
else:                                                # v5e/v6e: 128 MiB VMEM
    _MM_ROW_TILES = (1024, 512, 256, 128, 64, 32, 16, 8)
    _LANE_TILES = (512, 256, 128)
    _K_TILES = (1024, 512, 256, 128)
_LN_ROW_TILES = (1024, 512, 256, 128, 64, 32, 16, 8)


def _pick(dim, candidates):
    """Largest candidate tile that evenly divides dim; else the full dim."""
    for t in candidates:
        if t <= dim and dim % t == 0:
            return t
    return dim


def _pick_head_block(num_heads, d_kv, seq_len):
    """Heads per attention grid step: hblk*d_kv % 128 == 0 (lane dense), with a
    larger cap for short sequences to amortize per-step overhead."""
    cap = 1024 if seq_len <= 256 else 512
    best = None
    for hb in range(1, num_heads + 1):
        if num_heads % hb:
            continue
        w = hb * d_kv
        if w % 128 == 0 and w <= cap:
            best = hb
    return best if best is not None else num_heads


# ------------------------------ Pallas kernels -------------------------------

def _rmsnorm(x_f32, ln_w, eps, out_dtype):
    # T5LayerNorm: fp32 variance, no mean subtraction, no bias; cast to the
    # weight dtype before scaling (matches HF).
    var = jnp.mean(x_f32 * x_f32, axis=-1, keepdims=True)
    y = (x_f32 * jax.lax.rsqrt(var + eps)).astype(out_dtype)
    return ln_w * y


def _matmul_res_kernel(x_ref, w_ref, r_ref, o_ref, acc_ref):
    @pl.when(pl.program_id(2) == 0)
    def _():
        acc_ref[...] = jnp.zeros_like(acc_ref)

    acc_ref[...] += jnp.dot(x_ref[...], w_ref[...],
                            preferred_element_type=jnp.float32)

    @pl.when(pl.program_id(2) == pl.num_programs(2) - 1)
    def _():
        # Residual add fused into the epilogue (free VPU filler under the MXU).
        o_ref[...] = (acc_ref[...]
                      + r_ref[...].astype(jnp.float32)).astype(o_ref.dtype)


def pallas_matmul_residual(x, w, res):
    """(x @ w) + res, tiled with fp32 accumulation."""
    M, K = x.shape
    _, N = w.shape
    tm = _pick(M, _MM_ROW_TILES)
    tn = _pick(N, _LANE_TILES)
    tk = _pick(K, _K_TILES)
    return pl.pallas_call(
        _matmul_res_kernel,
        out_shape=jax.ShapeDtypeStruct((M, N), x.dtype),
        grid=(M // tm, N // tn, K // tk),
        in_specs=[pl.BlockSpec((tm, tk), lambda i, j, k: (i, k)),
                  pl.BlockSpec((tk, tn), lambda i, j, k: (k, j)),
                  pl.BlockSpec((tm, tn), lambda i, j, k: (i, j))],
        out_specs=pl.BlockSpec((tm, tn), lambda i, j, k: (i, j)),
        scratch_shapes=[pltpu.VMEM((tm, tn), jnp.float32)],
        compiler_params=pltpu.CompilerParams(
            dimension_semantics=("parallel", "parallel", "arbitrary"),
            vmem_limit_bytes=_VMEM_LIMIT),
    )(x, w, res)


def _rms_qkv_kernel(x_ref, ln_ref, wq_ref, wk_ref, wv_ref,
                    q_ref, k_ref, v_ref, xn_ref, *, eps):
    # RMSNorm hoisted: computed once per row tile (j == 0) into VMEM scratch.
    @pl.when(pl.program_id(1) == 0)
    def _():
        xn_ref[...] = _rmsnorm(x_ref[...].astype(jnp.float32), ln_ref[...],
                               eps, x_ref.dtype)

    xn = xn_ref[...]
    q_ref[...] = jnp.dot(xn, wq_ref[...],
                         preferred_element_type=jnp.float32).astype(q_ref.dtype)
    k_ref[...] = jnp.dot(xn, wk_ref[...],
                         preferred_element_type=jnp.float32).astype(k_ref.dtype)
    v_ref[...] = jnp.dot(xn, wv_ref[...],
                         preferred_element_type=jnp.float32).astype(v_ref.dtype)


def pallas_rmsnorm_qkv(x, ln_w, wq, wk, wv, eps=1e-6):
    M, D = x.shape
    N = wq.shape[1]
    tm = _pick(M, _MM_ROW_TILES)
    tn = _pick(N, _LANE_TILES)
    x_spec = pl.BlockSpec((tm, D), lambda i, j: (i, 0))
    ln_spec = pl.BlockSpec((1, D), lambda i, j: (0, 0))
    w_spec = pl.BlockSpec((D, tn), lambda i, j: (0, j))
    o_spec = pl.BlockSpec((tm, tn), lambda i, j: (i, j))
    out_sd = jax.ShapeDtypeStruct((M, N), x.dtype)
    return pl.pallas_call(
        functools.partial(_rms_qkv_kernel, eps=eps),
        out_shape=(out_sd, out_sd, out_sd),
        grid=(M // tm, N // tn),
        in_specs=[x_spec, ln_spec, w_spec, w_spec, w_spec],
        out_specs=(o_spec, o_spec, o_spec),
        scratch_shapes=[pltpu.VMEM((tm, D), x.dtype)],
        compiler_params=pltpu.CompilerParams(
            # j axis carries the xn scratch -> must be "arbitrary".
            dimension_semantics=("parallel", "arbitrary"),
            vmem_limit_bytes=_VMEM_LIMIT),
    )(x, ln_w.reshape(1, D), wq, wk, wv)


def _rms_ffn_kernel(x_ref, ln_ref, wi0_ref, wi1_ref, wo_ref, o_ref,
                    xn_ref, acc_ref, *, eps):
    j = pl.program_id(1)

    @pl.when(j == 0)
    def _():
        xn_ref[...] = _rmsnorm(x_ref[...].astype(jnp.float32), ln_ref[...],
                               eps, x_ref.dtype)
        acc_ref[...] = jnp.zeros_like(acc_ref)

    xn = xn_ref[...]
    h0 = jnp.dot(xn, wi0_ref[...], preferred_element_type=jnp.float32)
    h1 = jnp.dot(xn, wi1_ref[...], preferred_element_type=jnp.float32)
    # gelu_new kept in fp32 through the gate (tanh on EUP); h0*h0 reused.
    h0_sq = h0 * h0
    g = 0.5 * h0 * (1.0 + jnp.tanh(0.7978845608028654
                                   * h0 * (1.0 + 0.044715 * h0_sq)))
    h = (g * h1).astype(xn.dtype)
    acc_ref[...] += jnp.dot(h, wo_ref[...], preferred_element_type=jnp.float32)

    @pl.when(j == pl.num_programs(1) - 1)
    def _():
        # Residual (= the block's own input x) fused into the epilogue.
        o_ref[...] = (acc_ref[...]
                      + x_ref[...].astype(jnp.float32)).astype(o_ref.dtype)


def pallas_rmsnorm_ffn(x, ln_w, wi0, wi1, wo, eps=1e-6):
    """x + wo( gelu_new(wi0(rms(x))) * wi1(rms(x)) ), streamed over d_ff."""
    M, D = x.shape
    F = wi0.shape[1]
    tm = _pick(M, _MM_ROW_TILES)
    tf = _pick(F, _LANE_TILES)
    return pl.pallas_call(
        functools.partial(_rms_ffn_kernel, eps=eps),
        out_shape=jax.ShapeDtypeStruct((M, D), x.dtype),
        grid=(M // tm, F // tf),
        in_specs=[pl.BlockSpec((tm, D), lambda i, j: (i, 0)),
                  pl.BlockSpec((1, D), lambda i, j: (0, 0)),
                  pl.BlockSpec((D, tf), lambda i, j: (0, j)),
                  pl.BlockSpec((D, tf), lambda i, j: (0, j)),
                  pl.BlockSpec((tf, D), lambda i, j: (j, 0))],
        out_specs=pl.BlockSpec((tm, D), lambda i, j: (i, 0)),
        scratch_shapes=[pltpu.VMEM((tm, D), x.dtype),
                        pltpu.VMEM((tm, D), jnp.float32)],
        compiler_params=pltpu.CompilerParams(
            dimension_semantics=("parallel", "arbitrary"),
            vmem_limit_bytes=_VMEM_LIMIT),
    )(x, ln_w.reshape(1, D), wi0, wi1, wo)


def _rmsnorm_kernel(x_ref, w_ref, o_ref, *, eps):
    o_ref[...] = _rmsnorm(x_ref[...].astype(jnp.float32), w_ref[...], eps,
                          o_ref.dtype)


def pallas_rmsnorm(x, w, eps=1e-6):
    M, D = x.shape
    tm = _pick(M, _LN_ROW_TILES)
    return pl.pallas_call(
        functools.partial(_rmsnorm_kernel, eps=eps),
        out_shape=jax.ShapeDtypeStruct((M, D), x.dtype),
        grid=(M // tm,),
        in_specs=[pl.BlockSpec((tm, D), lambda i: (i, 0)),
                  pl.BlockSpec((1, D), lambda i: (0, 0))],
        out_specs=pl.BlockSpec((tm, D), lambda i: (i, 0)),
        compiler_params=pltpu.CompilerParams(
            dimension_semantics=("parallel",),
            vmem_limit_bytes=_VMEM_LIMIT),
    )(x, w.reshape(1, D))


def _attn_kernel(q_ref, k_ref, v_ref, bias_ref, mask_ref, o_ref, *,
                 heads_per_block, d_kv):
    # One (head-group, batch) per grid step; batch is the inner grid axis, so
    # the (hblk, S, S) bias block is resident across it.  Everything stays
    # fp32 in-kernel (bias + mask added in fp32 -> no bf16 -inf hazard).
    mask = mask_ref[0].astype(jnp.float32)                 # (1, S)
    q = q_ref[0]                                           # (S, hblk*Dk) — one
    k = k_ref[0]                                           # lane-dense load per
    v = v_ref[0]                                           # tensor per step
    ctx_parts = []
    # TODO(synk): per-head value slices at d_kv(<128)-lane offsets still cost a
    # relayout; a head-major projection layout would remove it at the price of
    # an in-kernel transpose in the projection kernel.
    for h in range(heads_per_block):                       # static unroll
        lo = h * d_kv
        qh = q[:, lo:lo + d_kv]                            # (S, Dk)
        kh = k[:, lo:lo + d_kv]
        vh = v[:, lo:lo + d_kv]
        bias = bias_ref[h].astype(jnp.float32) + mask      # (S, S)
        # T5 attention: NO 1/sqrt(d) scaling.
        s = jax.lax.dot_general(qh, kh, (((1,), (1,)), ((), ())),
                                preferred_element_type=jnp.float32) + bias
        s = s - jnp.max(s, axis=-1, keepdims=True)
        p = jnp.exp(s)
        p = p * pl.reciprocal(jnp.sum(p, axis=-1, keepdims=True), approx=True)
        p = p.astype(vh.dtype)                             # back to act dtype (HF)
        ctx_parts.append(jnp.dot(p, vh, preferred_element_type=jnp.float32))
    # Single lane-dense store per grid step (no per-head masked stores).
    o_ref[0] = jnp.concatenate(ctx_parts, axis=-1).astype(o_ref.dtype)


def pallas_attention(q, k, v, pos_bias, mask_add, num_heads, d_kv):
    # q, k, v: (B, S, H*Dk); pos_bias: (H, S, S); mask_add: (B, 1, S) fp32.
    B, S, N = q.shape
    hblk = _pick_head_block(num_heads, d_kv, S)
    qkv_spec = pl.BlockSpec((1, S, hblk * d_kv), lambda g, b: (b, 0, g))
    return pl.pallas_call(
        functools.partial(_attn_kernel, heads_per_block=hblk, d_kv=d_kv),
        out_shape=jax.ShapeDtypeStruct((B, S, N), q.dtype),
        grid=(num_heads // hblk, B),                       # batch innermost ->
        in_specs=[qkv_spec, qkv_spec, qkv_spec,            # bias block resident
                  pl.BlockSpec((hblk, S, S), lambda g, b: (g, 0, 0)),
                  pl.BlockSpec((1, 1, S), lambda g, b: (b, 0, 0))],
        out_specs=qkv_spec,
        compiler_params=pltpu.CompilerParams(
            dimension_semantics=("parallel", "parallel"),
            vmem_limit_bytes=_VMEM_LIMIT),
    )(q, k, v, pos_bias, mask_add)


# ------------------------------ T5 encoder glue ------------------------------

def _relative_position_bucket(relative_position, num_buckets=32, max_distance=128):
    # bidirectional (encoder) bucketing, same as HF T5Attention._relative_position_bucket
    num_buckets = num_buckets // 2
    relative_buckets = (relative_position > 0).astype(jnp.int32) * num_buckets
    relative_position = jnp.abs(relative_position)
    max_exact = num_buckets // 2
    is_small = relative_position < max_exact
    rp_f = jnp.maximum(relative_position, 1).astype(jnp.float32)
    rp_if_large = max_exact + (
        jnp.log(rp_f / max_exact) / jnp.log(max_distance / max_exact)
        * (num_buckets - max_exact)
    ).astype(jnp.int32)
    rp_if_large = jnp.minimum(rp_if_large, num_buckets - 1)
    return relative_buckets + jnp.where(is_small, relative_position, rp_if_large)


def compute_position_bias(rel_bias_table, seq_len, num_buckets, max_distance, dtype):
    ctx = jnp.arange(seq_len)[:, None]
    mem = jnp.arange(seq_len)[None, :]
    buckets = _relative_position_bucket(mem - ctx, num_buckets, max_distance)  # (S,S)
    bias = rel_bias_table[buckets]                              # (S, S, H)
    return jnp.transpose(bias, (2, 0, 1)).astype(dtype)         # (H, S, S)


def compute_mask_add(attention_mask, dtype):
    # Additive mask, kept fp32 and combined with the bias inside the kernel.
    neg = float(jnp.finfo(dtype).min)
    return ((1.0 - attention_mask.astype(jnp.float32)) * neg)[:, None, :]  # (B,1,S)


def t5_self_attention(h, layer_p, pos_bias, mask_add, cfg):
    B, S, D = h.shape
    H, Dk = cfg["num_heads"], cfg["d_kv"]
    N = H * Dk
    xf = h.reshape(B * S, D)
    q, k, v = pallas_rmsnorm_qkv(xf, layer_p["ln1"],
                                 layer_p["q"], layer_p["k"], layer_p["v"])
    ctx = pallas_attention(q.reshape(B, S, N), k.reshape(B, S, N),
                           v.reshape(B, S, N), pos_bias, mask_add, H, Dk)
    # Residual fused into the o-projection epilogue.
    return pallas_matmul_residual(ctx.reshape(B * S, N), layer_p["o"],
                                  xf).reshape(B, S, D)


def t5_encoder_forward(params, input_ids, attention_mask, cfg):
    B, S = input_ids.shape
    dtype = cfg["dtype"]
    # Embedding lookup (gather) — plain JAX glue.
    h = params["shared"][input_ids].astype(dtype)               # (B, S, D)
    D = h.shape[-1]

    pos_bias = compute_position_bias(params["rel_bias"], S, cfg["num_buckets"],
                                     cfg["max_distance"], dtype)
    mask_add = compute_mask_add(attention_mask, dtype)

    hidden_states = [h]                  # matches HF: embedding output first
    for layer_p in params["layers"]:
        # self-attention block (rmsnorm fused/hoisted, residual in epilogue)
        h = t5_self_attention(h, layer_p, pos_bias, mask_add, cfg)
        # feed-forward block (rmsnorm fused, gated GELU, F-tiled, residual fused)
        h = pallas_rmsnorm_ffn(h.reshape(B * S, D), layer_p["ln2"],
                               layer_p["wi0"], layer_p["wi1"],
                               layer_p["wo"]).reshape(B, S, D)
        hidden_states.append(h)

    final = pallas_rmsnorm(h.reshape(B * S, D),
                           params["final_ln"]).reshape(B, S, D)
    hidden_states[-1] = final            # HF replaces last entry with final-LN output

    # Mirrors BaseModelOutputWithPooling(last_hidden_state, None, hidden_states, attentions)
    return {
        "last_hidden_state": final,
        "pooler_output": None,
        "hidden_states": tuple(hidden_states),
        "attentions": None,
    }


# ------------------------------ parameter init -------------------------------

def init_params(key, cfg):
    D, F, H, Dk = cfg["d_model"], cfg["d_ff"], cfg["num_heads"], cfg["d_kv"]
    V, L, NB = cfg["vocab"], cfg["num_layers"], cfg["num_buckets"]
    dtype = cfg["dtype"]
    keys = iter(jax.random.split(key, 4 + 7 * L))

    def nrm(k, shape, scale=0.05):
        return (jax.random.normal(k, shape, jnp.float32) * scale).astype(dtype)

    params = {
        "shared": nrm(next(keys), (V, D), 1.0),
        "rel_bias": nrm(next(keys), (NB, H), 0.1),
        "final_ln": jnp.ones((D,), dtype),
        "layers": [],
    }
    for _ in range(L):
        params["layers"].append({
            "ln1": jnp.ones((D,), dtype),
            "q": nrm(next(keys), (D, H * Dk)),
            "k": nrm(next(keys), (D, H * Dk)),
            "v": nrm(next(keys), (D, H * Dk)),
            "o": nrm(next(keys), (H * Dk, D)),
            "ln2": jnp.ones((D,), dtype),
            "wi0": nrm(next(keys), (D, F)),
            "wi1": nrm(next(keys), (D, F)),
            "wo": nrm(next(keys), (F, D)),
        })
    return params


# ----------------------------------- main ------------------------------------

if __name__ == "__main__":
    cfg = {
        "vocab": 64,
        "d_model": 32,
        "d_ff": 64,
        "num_heads": 4,
        "d_kv": 8,
        "num_layers": 2,
        "num_buckets": 32,
        "max_distance": 128,
        "dtype": jnp.bfloat16,      # MT5Embedder default torch_dtype = bfloat16
    }
    B, S = 2, 16                     # small shapes (module max_length is 128)

    key = jax.random.PRNGKey(0)
    k_par, k_tok = jax.random.split(key)
    params = init_params(k_par, cfg)

    # TODO(synk): tokenizer (string -> ids) has no numerical Pallas equivalent;
    # deterministic token ids stand in for tokenizer output.
    tokens = jax.random.randint(k_tok, (B, S), 0, cfg["vocab"], dtype=jnp.int32)
    lengths = jnp.array([S, 10], dtype=jnp.int32)
    attention_mask = (jnp.arange(S)[None, :] < lengths[:, None]).astype(jnp.int32)

    out = t5_encoder_forward(params, tokens, attention_mask, cfg)
    jax.block_until_ready(out["last_hidden_state"])
    jax.block_until_ready(out["hidden_states"])

    assert out["last_hidden_state"].shape == (B, S, cfg["d_model"])
    assert len(out["hidden_states"]) == cfg["num_layers"] + 1
    assert bool(jnp.all(jnp.isfinite(out["last_hidden_state"].astype(jnp.float32))))
    print("KERNEL_OK")
</pallas_src>

<mosaic_0001>
module attributes {stable_mosaic.version = 11 : i64} {
  func.func @_rms_qkv_kernel(%arg0: i32, %arg1: i32, %arg2: memref<32x32xbf16, #tpu.memory_space<vmem>>, %arg3: memref<1x32xbf16, #tpu.memory_space<vmem>>, %arg4: memref<32x32xbf16, #tpu.memory_space<vmem>>, %arg5: memref<32x32xbf16, #tpu.memory_space<vmem>>, %arg6: memref<32x32xbf16, #tpu.memory_space<vmem>>, %arg7: memref<32x32xbf16, #tpu.memory_space<vmem>>, %arg8: memref<32x32xbf16, #tpu.memory_space<vmem>>, %arg9: memref<32x32xbf16, #tpu.memory_space<vmem>>, %arg10: memref<32x32xbf16, #tpu.memory_space<vmem>>) attributes {dimension_semantics = [#tpu.dimension_semantics<parallel>, #tpu.dimension_semantics<arbitrary>], iteration_bounds = array<i64: 1, 1>, scalar_prefetch = 0 : i64, scratch_operands = 1 : i64, tpu.core_type = #tpu.core_type<tc>, window_params = [{transform_indices = @transform_0, window_bounds = array<i64: 32, 32>}, {pipeline_mode = #tpu.pipeline_mode<synchronous>, transform_indices = @transform_1, window_bounds = array<i64: 1, 32>}, {transform_indices = @transform_2, window_bounds = array<i64: 32, 32>}, {transform_indices = @transform_3, window_bounds = array<i64: 32, 32>}, {transform_indices = @transform_4, window_bounds = array<i64: 32, 32>}, {transform_indices = @transform_5, window_bounds = array<i64: 32, 32>}, {transform_indices = @transform_6, window_bounds = array<i64: 32, 32>}, {transform_indices = @transform_7, window_bounds = array<i64: 32, 32>}]} {
    %c0_i32 = arith.constant 0 : i32
    %0 = arith.cmpi eq, %arg1, %c0_i32 : i32
    %1 = arith.extui %0 : i1 to i32
    %c0_i32_0 = arith.constant 0 : i32
    %2 = arith.cmpi ne, %1, %c0_i32_0 : i32
    scf.if %2 {
      %c0_16 = arith.constant 0 : index
      %c0_17 = arith.constant 0 : index
      %16 = vector.load %arg2[%c0_16, %c0_17] : memref<32x32xbf16, #tpu.memory_space<vmem>>, vector<32x32xbf16>
      %17 = arith.extf %16 : vector<32x32xbf16> to vector<32x32xf32>
      %c0_18 = arith.constant 0 : index
      %c0_19 = arith.constant 0 : index
      %18 = vector.load %arg3[%c0_18, %c0_19] : memref<1x32xbf16, #tpu.memory_space<vmem>>, vector<1x32xbf16>
      %19 = arith.mulf %17, %17 : vector<32x32xf32>
      %cst_20 = arith.constant dense<0.000000e+00> : vector<32xf32>
      %20 = vector.multi_reduction <add>, %19, %cst_20 [1] : vector<32x32xf32> to vector<32xf32>
      %21 = vector.shape_cast %20 : vector<32xf32> to vector<32x1xf32>
      %cst_21 = arith.constant 3.200000e+01 : f32
      %22 = vector.broadcast %cst_21 : f32 to vector<32x1xf32>
      %23 = arith.divf %21, %22 : vector<32x1xf32>
      %cst_22 = arith.constant 9.99999997E-7 : f32
      %24 = vector.broadcast %cst_22 : f32 to vector<32x1xf32>
      %25 = arith.addf %23, %24 : vector<32x1xf32>
      %26 = math.rsqrt %25 : vector<32x1xf32>
      %27 = vector.broadcast %26 : vector<32x1xf32> to vector<32x32xf32>
      %28 = arith.mulf %17, %27 : vector<32x32xf32>
      %29 = arith.truncf %28 : vector<32x32xf32> to vector<32x32xbf16>
      %30 = vector.broadcast %18 : vector<1x32xbf16> to vector<32x32xbf16>
      %31 = arith.mulf %30, %29 : vector<32x32xbf16>
      %c0_23 = arith.constant 0 : index
      %c0_24 = arith.constant 0 : index
      %32 = vector.load %arg10[%c0_23, %c0_24] : memref<32x32xbf16, #tpu.memory_space<vmem>>, vector<32x32xbf16>
      tpu.vector_store %arg10[%c0_23, %c0_24], %31 {strides = array<i32>} : memref<32x32xbf16, #tpu.memory_space<vmem>>, vector<32x32xbf16>,
    } else {
    }
    %c0 = arith.constant 0 : index
    %c0_1 = arith.constant 0 : index
    %3 = vector.load %arg10[%c0, %c0_1] : memref<32x32xbf16, #tpu.memory_space<vmem>>, vector<32x32xbf16>
    %c0_2 = arith.constant 0 : index
    %c0_3 = arith.constant 0 : index
    %4 = vector.load %arg4[%c0_2, %c0_3] : memref<32x32xbf16, #tpu.memory_space<vmem>>, vector<32x32xbf16>
    %cst = arith.constant dense<0.000000e+00> : vector<32x32xf32>
    %5 = tpu.matmul %3, %4, %cst {dimension_numbers = #tpu.dot_dimension_numbers<[1], [0], [0], [1], [0, 0, 1, 1], [], []>} : vector<32x32xbf16>, vector<32x32xbf16>, vector<32x32xf32> -> vector<32x32xf32>
    %6 = arith.truncf %5 : vector<32x32xf32> to vector<32x32xbf16>
    %c0_4 = arith.constant 0 : index
    %c0_5 = arith.constant 0 : index
    %7 = vector.load %arg7[%c0_4, %c0_5] : memref<32x32xbf16, #tpu.memory_space<vmem>>, vector<32x32xbf16>
    tpu.vector_store %arg7[%c0_4, %c0_5], %6 {strides = array<i32>} : memref<32x32xbf16, #tpu.memory_space<vmem>>, vector<32x32xbf16>,
    %c0_6 = arith.constant 0 : index
    %c0_7 = arith.constant 0 : index
    %8 = vector.load %arg5[%c0_6, %c0_7] : memref<32x32xbf16, #tpu.memory_space<vmem>>, vector<32x32xbf16>
    %cst_8 = arith.constant dense<0.000000e+00> : vector<32x32xf32>
    %9 = tpu.matmul %3, %8, %cst_8 {dimension_numbers = #tpu.dot_dimension_numbers<[1], [0], [0], [1], [0, 0, 1, 1], [], []>} : vector<32x32xbf16>, vector<32x32xbf16>, vector<32x32xf32> -> vector<32x32xf32>
    %10 = arith.truncf %9 : vector<32x32xf32> to vector<32x32xbf16>
    %c0_9 = arith.constant 0 : index
    %c0_10 = arith.constant 0 : index
    %11 = vector.load %arg8[%c0_9, %c0_10] : memref<32x32xbf16, #tpu.memory_space<vmem>>, vector<32x32xbf16>
    tpu.vector_store %arg8[%c0_9, %c0_10], %10 {strides = array<i32>} : memref<32x32xbf16, #tpu.memory_space<vmem>>, vector<32x32xbf16>,
    %c0_11 = arith.constant 0 : index
    %c0_12 = arith.constant 0 : index
    %12 = vector.load %arg6[%c0_11, %c0_12] : memref<32x32xbf16, #tpu.memory_space<vmem>>, vector<32x32xbf16>
    %cst_13 = arith.constant dense<0.000000e+00> : vector<32x32xf32>
    %13 = tpu.matmul %3, %12, %cst_13 {dimension_numbers = #tpu.dot_dimension_numbers<[1], [0], [0], [1], [0, 0, 1, 1], [], []>} : vector<32x32xbf16>, vector<32x32xbf16>, vector<32x32xf32> -> vector<32x32xf32>
    %14 = arith.truncf %13 : vector<32x32xf32> to vector<32x32xbf16>
    %c0_14 = arith.constant 0 : index
    %c0_15 = arith.constant 0 : index
    %15 = vector.load %arg9[%c0_14, %c0_15] : memref<32x32xbf16, #tpu.memory_space<vmem>>, vector<32x32xbf16>
    tpu.vector_store %arg9[%c0_14, %c0_15], %14 {strides = array<i32>} : memref<32x32xbf16, #tpu.memory_space<vmem>>, vector<32x32xbf16>,
    return
  }
  func.func @transform_0(%arg0: i32, %arg1: i32) -> (i32, i32) {
    %c0_i32 = arith.constant 0 : i32
    %c0_i32_0 = arith.constant 0 : i32
    return %arg0, %c0_i32 : i32, i32
  }
  func.func @transform_1(%arg0: i32, %arg1: i32) -> (i32, i32) {
    %c0_i32 = arith.constant 0 : i32
    %c0_i32_0 = arith.constant 0 : i32
    %c0_i32_1 = arith.constant 0 : i32
    return %c0_i32, %c0_i32_0 : i32, i32
  }
  func.func @transform_2(%arg0: i32, %arg1: i32) -> (i32, i32) {
    %c0_i32 = arith.constant 0 : i32
    %c0_i32_0 = arith.constant 0 : i32
    return %c0_i32, %arg1 : i32, i32
  }
  func.func @transform_3(%arg0: i32, %arg1: i32) -> (i32, i32) {
    %c0_i32 = arith.constant 0 : i32
    %c0_i32_0 = arith.constant 0 : i32
    return %c0_i32, %arg1 : i32, i32
  }
  func.func @transform_4(%arg0: i32, %arg1: i32) -> (i32, i32) {
    %c0_i32 = arith.constant 0 : i32
    %c0_i32_0 = arith.constant 0 : i32
    return %c0_i32, %arg1 : i32, i32
  }
  func.func @transform_5(%arg0: i32, %arg1: i32) -> (i32, i32) {
    %c0_i32 = arith.constant 0 : i32
    return %arg0, %arg1 : i32, i32
  }
  func.func @transform_6(%arg0: i32, %arg1: i32) -> (i32, i32) {
    %c0_i32 = arith.constant 0 : i32
    return %arg0, %arg1 : i32, i32
  }
  func.func @transform_7(%arg0: i32, %arg1: i32) -> (i32, i32) {
    %c0_i32 = arith.constant 0 : i32
    return %arg0, %arg1 : i32, i32
  }
}

</mosaic_0001>

<bundles_post_ra>
// kernel: tpu_custom_call.1
= control target key start
LH: loop header
LB: loop body
LE: loop exit
PB: predicated region body
PF: predicated region fallthrough
CT: control target
= control target key end

     0   :  { %13 = vsyncpa [#allocation4], 0  ;;  %s926_s0 = inlined_call_operand.hbm [shape: bf16[32,32], index: 0, kind: input, shape index: {}]   ;;  %s927_s1 = inlined_call_operand.vmem [shape: bf16[1,32], index: 1, kind: input, shape index: {}]   ;;  %s928_s2 = inlined_call_operand.hbm [shape: bf16[32,32], index: 2, kind: input, shape index: {}]   ;;  %s929_s3 = inlined_call_operand.hbm [shape: bf16[32,32], index: 3, kind: input, shape index: {}]   ;;  %s930_s4 = inlined_call_operand.hbm [shape: bf16[32,32], index: 4, kind: input, shape index: {}]   ;;  %s931_s5 = inlined_call_operand.hbm [shape: bf16[32,32], index: 5, kind: output, shape index: {0}]   ;;  %s932_s6 = inlined_call_operand.hbm [shape: bf16[32,32], index: 6, kind: output, shape index: {1}]   ;;  %s933_s7 = inlined_call_operand.hbm [shape: bf16[32,32], index: 7, kind: output, shape index: {2}]  }
   0x1   :  { %14 = vsyncpa [#allocation7], 0 }
   0x2   :  { %15 = vsyncpa [#allocation10], 0 }
   0x3   :  { %16 = vsyncpa [#allocation5], 0 }
   0x4   :  { %17 = vsyncpa [#allocation13], 0  ;;  %s724_s24 = smov [#allocation6]   ;;  %s725_s26 = smov [#allocation3]  }
   0x5   :  { %s37_s25 = sshll.u32 %s724_s24, 4  ;;  %s23_s27 = sshll.u32 %s725_s26, 4  ;;  %s38_s25 = int_to_ptr.vmem [resolvable:$true] %s37_s25  ;;  %s773_s27 = int_to_ptr.vmem [resolvable:$true] %s23_s27 }
   0x6   :  { %s560_s30 = scalar_lea.hbm %s928_s2, 256 }
   0x7   :  { %p561_p0 = scmp.ne.s32.totalorder %s928_s2, %s560_s30  ;;  %p564_p1 = scmp.lt.u32.totalorder %s560_s30, %s928_s2 }
   0x9   :  { %p566_p2 = pnand %p564_p1, %p561_p0 }
   0xb   :  { %569 = shalt.err (!%p566_p2)
}
   0xc   :  { %s570_s12 = scalar_lea.vmem %s38_s25, 256  ;;  %p575_p4 = scmp.lt.s32.totalorder %s38_s25, %s38_s25 }
   0xd   :  { %p571_p3 = scmp.ne.s32.totalorder %s38_s25, %s570_s12  ;;  %p576_p5 = scmp.lt.s32.totalorder %s570_s12, %s570_s12 }
   0xf   :  { %p577_p6 = por %p576_p5, %p575_p4 }
  0x11   :  { %p578_p7 = pnand %p577_p6, %p571_p3 }
  0x13   :  { %581 = shalt.err (!%p578_p7)
}
  0x14   :  { %s726_s13 = smov 64   ;;  %s727_s14 = smov 4  }
  0x15   :  { %43 = dma.hbm_to_vmem [thread:$0]  %s928_s2, 256, %s38_s25, [#allocation7], %s726_s13, %s726_s13, %s727_s14  }
  0x16   :  { %s582_s19 = scalar_lea.hbm %s926_s0, 256 }
  0x17   :  { %p583_p8 = scmp.ne.s32.totalorder %s926_s0, %s582_s19  ;;  %p586_p9 = scmp.lt.u32.totalorder %s582_s19, %s926_s0 }
  0x19   :  { %p588_p10 = pnand %p586_p9, %p583_p8 }
  0x1b   :  { %591 = shalt.err (!%p588_p10)
}
  0x1c   :  { %s592_s24 = scalar_lea.vmem %s773_s27, 256  ;;  %p597_p12 = scmp.lt.s32.totalorder %s773_s27, %s773_s27 }
  0x1d   :  { %p593_p11 = scmp.ne.s32.totalorder %s773_s27, %s592_s24  ;;  %p598_p13 = scmp.lt.s32.totalorder %s592_s24, %s592_s24 }
  0x1f   :  { %p599_p0 = por %p598_p13, %p597_p12 }
  0x21   :  { %p600_p1 = pnand %p599_p0, %p593_p11 }
  0x23   :  { %603 = shalt.err (!%p600_p1)
}
  0x24   :  { %29 = dma.hbm_to_vmem [thread:$0]  %s926_s0, 256, %s773_s27, [#allocation4], %s726_s13, %s726_s13, %s727_s14  }
  0x25   :  { %s728_s26 = smov [#allocation8]   ;;  %s729_s29 = smov [#allocation9]  }
  0x26   :  { %s49_s28 = sshll.u32 %s728_s26, 4  ;;  %s61_s30 = sshll.u32 %s729_s29, 4  ;;  %s50_s28 = int_to_ptr.vmem [resolvable:$true] %s49_s28  ;;  %s810_s30 = int_to_ptr.vmem [resolvable:$true] %s61_s30 }
  0x27   :  { %s604_s10 = scalar_lea.hbm %s929_s3, 256 }
  0x28   :  { %p605_p2 = scmp.ne.s32.totalorder %s929_s3, %s604_s10  ;;  %p608_p3 = scmp.lt.u32.totalorder %s604_s10, %s929_s3 }
  0x2a   :  { %p610_p4 = pnand %p608_p3, %p605_p2 }
  0x2c   :  { %613 = shalt.err (!%p610_p4)
}
  0x2d   :  { %s614_s0 = scalar_lea.vmem %s50_s28, 256  ;;  %p619_p6 = scmp.lt.s32.totalorder %s50_s28, %s50_s28 }
  0x2e   :  { %p615_p5 = scmp.ne.s32.totalorder %s50_s28, %s614_s0  ;;  %p620_p7 = scmp.lt.s32.totalorder %s614_s0, %s614_s0 }
  0x30   :  { %p621_p8 = por %p620_p7, %p619_p6 }
  0x32   :  { %p622_p9 = pnand %p621_p8, %p615_p5 }
  0x34   :  { %625 = shalt.err (!%p622_p9)
}
  0x35   :  { %55 = dma.hbm_to_vmem [thread:$0]  %s929_s3, 256, %s50_s28, [#allocation7], %s726_s13, %s726_s13, %s727_s14  }
  0x36   :  { %s626_s20 = scalar_lea.hbm %s930_s4, 256 }
  0x37   :  { %p627_p10 = scmp.ne.s32.totalorder %s930_s4, %s626_s20  ;;  %p630_p11 = scmp.lt.u32.totalorder %s626_s20, %s930_s4 }
  0x39   :  { %p632_p12 = pnand %p630_p11, %p627_p10 }
  0x3b   :  { %635 = shalt.err (!%p632_p12)
}
  0x3c   :  { %s636_s2 = scalar_lea.vmem %s810_s30, 256  ;;  %p641_p0 = scmp.lt.s32.totalorder %s810_s30, %s810_s30 }
  0x3d   :  { %p637_p13 = scmp.ne.s32.totalorder %s810_s30, %s636_s2  ;;  %p642_p1 = scmp.lt.s32.totalorder %s636_s2, %s636_s2 }
  0x3f   :  { %p643_p2 = por %p642_p1, %p641_p0 }
  0x41   :  { %p644_p3 = pnand %p643_p2, %p637_p13 }
  0x43   :  { %647 = shalt.err (!%p644_p3)
}
  0x44   :  { %67 = dma.hbm_to_vmem [thread:$0]  %s930_s4, 256, %s810_s30, [#allocation10], %s726_s13, %s726_s13, %s727_s14  }
  0x45   :  { %714 = dma.done.wait [#allocation4], 256  }
  0x46   :  { %715 = vsyncadd [#allocation4], 4294967040 }
  0x47   :  { %716 = dma.done.wait [#allocation7], 512  }
  0x48   :  { %717 = vsyncadd [#allocation7], 4294966784 }
  0x49   :  { %718 = dma.done.wait [#allocation10], 256  }
  0x4a   :  { %719 = vsyncadd [#allocation10], 4294967040  ;;  %v500_v0 = vld [vmem:[#allocation3 + $0x8] sm:$0xff]   ;;  %vm98_vm0 = vcmask 261120   ;;  %v493_v1 = vld [vmem:[#allocation3] sm:$0xff]   ;;  %v133_v31 = vlaneseq  ;;  %vm231_vm1 = vcmask 257024  }
  0x4b   :  { %v498_v2 = vunpack.c.l.bf16 %v500_v0  ;;  %v494_v3 = vunpack.c.l.bf16 %v493_v1  ;;  %v499_v4 = vunpack.c.h.bf16 %v500_v0  ;;  %v495_v5 = vunpack.c.h.bf16 %v493_v1  ;;  %v546_v14 = vld [vmem:[#allocation6] sm:$0xff]   ;;  %v547_v15 = vld [vmem:[#allocation8] sm:$0xff]   ;;  %v548_v16 = vld [vmem:[#allocation6 + $0x8] sm:$0xff]   ;;  %s731_s29 = smov [#allocation11]  }
  0x4c   :  { %v549_v17 = vld [vmem:[#allocation8 + $0x8] sm:$0xff]   ;;  %513 = vmatprep.subr.bf16.mxu0 %v546_v14  ;;  %521 = vmatprep.subr.bf16.mxu1 %v547_v15  ;;  %v550_v18 = vld [vmem:[#allocation9] sm:$0xff]   ;;  %v134_v32 = vshrl.u32 %v133_v31, 7  ;;  %v551_v51 = vld [vmem:[#allocation9 + $0x8] sm:$0xff]   ;;  %s411_s30 = sshll.u32 %s731_s29, 4  ;;  %s868_s30 = int_to_ptr.vmem [resolvable:$true] %s411_s30 }
  0x4d   :  { %v96_v6 = vmul.f32 %v498_v2, %v498_v2  ;;  %v94_v7 = vmul.f32 %v494_v3, %v494_v3  ;;  %v97_v8 = vmul.f32 %v499_v4, %v499_v4  ;;  %v95_v9 = vmul.f32 %v495_v5, %v495_v5  ;;  %514 = vmatpush3.bf16.msra.mxu0 %v546_v14  ;;  %v93_v33 = vld [vmem:[%s927_s1] sm:$0x1]  ;;  %s730_s1 = smov [#allocation12]  }
  0x4e   :  { %522 = vmatpush3.bf16.msra.mxu1 %v547_v15  ;;  %515 = vmatprep.subr.bf16.mxu0 %v548_v16  ;;  %v131_v34 = vpack.i.b16 %v93_v33, %v93_v33  ;;  %v135_v35 = vsub.s32 0, %v134_v32  ;;  %s423_s28 = sshll.u32 %s730_s1, 4  ;;  %s424_s28 = int_to_ptr.vmem [resolvable:$true] %s423_s28 }
  0x4f   :  { %v105_v10 = vsel %vm98_vm0, %v96_v6, 0.0  ;;  %v99_v11 = vsel %vm98_vm0, %v94_v7, 0.0  ;;  %v108_v12 = vsel %vm98_vm0, %v97_v8, 0.0  ;;  %v102_v13 = vsel %vm98_vm0, %v95_v9, 0.0  ;;  %523 = vmatprep.subr.bf16.mxu1 %v549_v17  ;;  %s648_s8 = scalar_lea.vmem %s424_s28, 256  ;;  %p653_p5 = scmp.lt.s32.totalorder %s424_s28, %s424_s28 }
  0x50   :  { %106 = vadd.xlane.f32.xlu1 %v105_v10  ;;  %100 = vadd.xlane.f32.xlu0 %v99_v11  ;;  %v136_v41 = vrot.slane %v131_v34, %v135_v35  ;;  %p649_p4 = scmp.ne.s32.totalorder %s424_s28, %s648_s8  ;;  %p654_p6 = scmp.lt.s32.totalorder %s648_s8, %s648_s8 }
  0x51   :  { %516 = vmatpush3.bf16.msra.mxu0 %v548_v16 }
  0x52   :  { %524 = vmatpush3.bf16.msra.mxu1 %v549_v17  ;;  %529 = vmatprep.subr.bf16.mxu0 %v550_v18  ;;  %p655_p7 = por %p654_p6, %p653_p5 }
  0x54   :  { %109 = vadd.xlane.f32.xlu1 %v108_v12  ;;  %103 = vadd.xlane.f32.xlu0 %v102_v13  ;;  %p656_p8 = pnand %p655_p7, %p649_p4 }
  0xdd   :  { %v107_v19 = vpop.xlane.xlu1 %106  ;;  %v101_v20 = vpop.xlane.xlu0 %100 }
  0xde   :  { %v114_v21 = vmul.f32 0.03125, %v107_v19  ;;  %v112_v22 = vmul.f32 0.03125, %v101_v20 }
  0xe0   :  { %v118_v23 = vadd.f32 1e-06, %v114_v21  ;;  %v116_v24 = vadd.f32 1e-06, %v112_v22 }
  0xe1   :  { %v110_v25 = vpop.xlane.xlu1 %109  ;;  %v104_v26 = vpop.xlane.xlu0 %103 }
  0xe2   :  { %v115_v27 = vmul.f32 0.03125, %v110_v25  ;;  %v113_v28 = vmul.f32 0.03125, %v104_v26  ;;  %552 = vrsqrt.f32 %v118_v23 }
  0xe3   :  { %554 = vrsqrt.f32 %v116_v24 }
  0xe4   :  { %v119_v29 = vadd.f32 1e-06, %v115_v27  ;;  %v117_v30 = vadd.f32 1e-06, %v113_v28 }
  0xe6   :  { %556 = vrsqrt.f32 %v119_v29 }
  0xe7   :  { %558 = vrsqrt.f32 %v117_v30 }
  0xec   :  { %v553_v36 = vpop.eup %552 }
  0xed   :  { %v555_v37 = vpop.eup %554  ;;  %v126_v40 = vmul.f32 %v553_v36, %v498_v2 }
  0xee   :  { %v124_v43 = vmul.f32 %v555_v37, %v494_v3 }
  0xf0   :  { %v557_v38 = vpop.eup %556 }
  0xf1   :  { %v559_v39 = vpop.eup %558  ;;  %v127_v42 = vmul.f32 %v557_v38, %v499_v4 }
  0xf2   :  { %v125_v44 = vmul.f32 %v559_v39, %v495_v5 }
  0xf3   :  { %v129_v45 = vpack.c.bf16 %v127_v42, %v126_v40 }
  0xf4   :  { %v128_v46 = vpack.c.bf16 %v125_v44, %v124_v43 }
  0xf5   :  { %v138_v47 = vmul.bf16 %v136_v41, %v129_v45 }
  0xf6   :  { %v137_v48 = vmul.bf16 %v136_v41, %v128_v46 }
  0xf7   :  { %140 = vst.msk [vmem:[#allocation2 + $0x8] sm:$0xff] %vm98_vm0, %v138_v47 }
  0xf8   :  { %139 = vst.msk [vmem:[#allocation2] sm:$0xff] %vm98_vm0, %v137_v48 }
  0xfe   :  { %v142_v49 = vld [vmem:[#allocation2 + $0x8] sm:$0xff] }
  0xff   :  { %v141_v50 = vld [vmem:[#allocation2] sm:$0xff] }
 0x100   :  { %517 = vmatprep.mubr.msk.bf16.mxu0 %vm98_vm0, %v141_v50  ;;  %525 = vmatprep.mubr.msk.bf16.mxu1 %vm98_vm0, %v141_v50 }
 0x101   :  { %518 = vmatmul.mubr.msk.bf16.vlgmr.msra.gmra.mrb[0].mxu0 %vm98_vm0, %v142_v49  ;;  %526 = vmatmul.mubr.msk.bf16.vlgmr.msra.gmra.mrb[0].mxu1 %vm98_vm0, %v142_v49 }
 0x102   :  { %530 = vmatpush3.bf16.msra.mxu0 %v550_v18  ;;  %533 = vmatprep.mubr.msk.bf16.mxu0 %vm98_vm0, %v141_v50 }
 0x103   :  { %531 = vmatprep.subr.bf16.mxu0 %v551_v51 }
 0x106   :  { %532 = vmatpush3.bf16.msra.mxu0 %v551_v51 }
 0x109   :  { %534 = vmatmul.mubr.msk.bf16.vlgmr.msra.gmra.mrb[4].mxu0 %vm98_vm0, %v142_v49 }
 0x1d4   :  { %v519_v52 = vpop.f32.mrb[0].mxu0  ;;  %v527_v53 = vpop.f32.mrb[0].mxu1 }
 0x1d5   :  { %v482_v54 = vpack.c.bf16 %v519_v52, %v519_v52  ;;  %v486_v55 = vpack.c.bf16 %v527_v53, %v527_v53  ;;  %v200_v56 = vpop.f32.mrb[1].mxu0  ;;  %v286_v57 = vpop.f32.mrb[1].mxu1 }
 0x1d6   :  { %v480_v58 = vpack.c.bf16 %v200_v56, %v200_v56  ;;  %v484_v59 = vpack.c.bf16 %v286_v57, %v286_v57  ;;  %v520_v60 = vpop.f32.mrb[2].mxu0  ;;  %v528_v61 = vpop.f32.mrb[2].mxu1 }
 0x1d7   :  { %234 = vst.msk [vmem:[#allocation11 + $0x8] sm:$0xf] %vm231_vm1, %v482_v54  ;;  %319 = vst.msk [vmem:[#allocation12 + $0x8] sm:$0xf] %vm231_vm1, %v486_v55  ;;  %v483_v62 = vpack.c.bf16 %v520_v60, %v520_v60  ;;  %v487_v63 = vpack.c.bf16 %v528_v61, %v528_v61  ;;  %v203_v0 = vpop.f32.mrb[3].mxu0  ;;  %v289_v1 = vpop.f32.mrb[3].mxu1 }
 0x1d8   :  { %232 = vst.msk [vmem:[#allocation11] sm:$0xf] %vm231_vm1, %v480_v58  ;;  %317 = vst.msk [vmem:[#allocation12] sm:$0xf] %vm231_vm1, %v484_v59  ;;  %v481_v2 = vpack.c.bf16 %v203_v0, %v203_v0  ;;  %v485_v3 = vpack.c.bf16 %v289_v1, %v289_v1 }
 0x1d9   :  { %235 = vst.msk [vmem:[#allocation11 + $0xc] sm:$0xf] %vm231_vm1, %v483_v62  ;;  %320 = vst.msk [vmem:[#allocation12 + $0xc] sm:$0xf] %vm231_vm1, %v487_v63 }
 0x1da   :  { %233 = vst.msk [vmem:[#allocation11 + $0x4] sm:$0xf] %vm231_vm1, %v481_v2  ;;  %318 = vst.msk [vmem:[#allocation12 + $0x4] sm:$0xf] %vm231_vm1, %v485_v3 }
 0x1db   :  { %659 = shalt.err (!%p656_p8)
}
 0x1dc   :  { %s660_s11 = scalar_lea.hbm %s932_s6, 256 }
 0x1dd   :  { %p661_p9 = scmp.ne.s32.totalorder %s932_s6, %s660_s11  ;;  %p664_p10 = scmp.lt.u32.totalorder %s660_s11, %s932_s6 }
 0x1df   :  { %p666_p11 = pnand %p664_p10, %p661_p9 }
 0x1e1   :  { %669 = shalt.err (!%p666_p11)
}
 0x1e2   :  { %429 = dma.vmem_to_hbm [thread:$0]  %s424_s28, 256, %s932_s6, [#allocation13], %s726_s13, %s726_s13, %s727_s14   ;;  %v535_v4 = vpop.f32.mrb[4].mxu0 }
 0x1e3   :  { %s670_s18 = scalar_lea.vmem %s868_s30, 256  ;;  %p675_p13 = scmp.lt.s32.totalorder %s868_s30, %s868_s30 }
 0x1e4   :  { %p671_p12 = scmp.ne.s32.totalorder %s868_s30, %s670_s18  ;;  %p676_p0 = scmp.lt.s32.totalorder %s670_s18, %s670_s18 }
 0x1e6   :  { %p677_p1 = por %p676_p0, %p675_p13 }
 0x1e8   :  { %p678_p2 = pnand %p677_p1, %p671_p12 }
 0x1ea   :  { %681 = shalt.err (!%p678_p2)
}
 0x1eb   :  { %s682_s21 = scalar_lea.hbm %s931_s5, 256 }
 0x1ec   :  { %p683_p3 = scmp.ne.s32.totalorder %s931_s5, %s682_s21  ;;  %p686_p4 = scmp.lt.u32.totalorder %s682_s21, %s931_s5 }
 0x1ee   :  { %p688_p5 = pnand %p686_p4, %p683_p3 }
 0x1f0   :  { %691 = shalt.err (!%p688_p5)
}
 0x1f1   :  { %417 = dma.vmem_to_hbm [thread:$0]  %s868_s30, 256, %s931_s5, [#allocation5], %s726_s13, %s726_s13, %s727_s14   ;;  %v490_v5 = vpack.c.bf16 %v535_v4, %v535_v4  ;;  %v371_v6 = vpop.f32.mrb[5].mxu0 }
 0x1f2   :  { %s732_s25 = smov [#allocation14]   ;;  %v488_v7 = vpack.c.bf16 %v371_v6, %v371_v6  ;;  %v536_v8 = vpop.f32.mrb[6].mxu0 }
 0x1f3   :  { %s435_s4 = sshll.u32 %s732_s25, 4  ;;  %404 = vst.msk [vmem:[#allocation14 + $0x8] sm:$0xf] %vm231_vm1, %v490_v5  ;;  %v491_v9 = vpack.c.bf16 %v536_v8, %v536_v8  ;;  %v374_v10 = vpop.f32.mrb[7].mxu0  ;;  %s436_s4 = int_to_ptr.vmem [resolvable:$true] %s435_s4 }
 0x1f4   :  { %402 = vst.msk [vmem:[#allocation14] sm:$0xf] %vm231_vm1, %v488_v7  ;;  %v489_v11 = vpack.c.bf16 %v374_v10, %v374_v10  ;;  %s692_s26 = scalar_lea.vmem %s436_s4, 256  ;;  %p697_p7 = scmp.lt.s32.totalorder %s436_s4, %s436_s4 }
 0x1f5   :  { %405 = vst.msk [vmem:[#allocation14 + $0xc] sm:$0xf] %vm231_vm1, %v491_v9  ;;  %p693_p6 = scmp.ne.s32.totalorder %s436_s4, %s692_s26  ;;  %p698_p8 = scmp.lt.s32.totalorder %s692_s26, %s692_s26 }
 0x1f6   :  { %403 = vst.msk [vmem:[#allocation14 + $0x4] sm:$0xf] %vm231_vm1, %v489_v11 }
 0x1f7   :  { %p699_p9 = por %p698_p8, %p697_p7 }
 0x1f9   :  { %p700_p10 = pnand %p699_p9, %p693_p6 }
 0x1fb   :  { %703 = shalt.err (!%p700_p10)
}
 0x1fc   :  { %s704_s28 = scalar_lea.hbm %s933_s7, 256 }
 0x1fd   :  { %p705_p11 = scmp.ne.s32.totalorder %s933_s7, %s704_s28  ;;  %p708_p12 = scmp.lt.u32.totalorder %s704_s28, %s933_s7 }
 0x1ff   :  { %p710_p13 = pnand %p708_p12, %p705_p11 }
 0x201   :  { %713 = shalt.err (!%p710_p13)
}
 0x202   :  { %441 = dma.vmem_to_hbm [thread:$0]  %s436_s4, 256, %s933_s7, [#allocation13], %s726_s13, %s726_s13, %s727_s14  }
 0x203   :  { %720 = dma.done.wait [#allocation5], 256  }
 0x204   :  { %721 = vsyncadd [#allocation5], 4294967040 }
 0x205   :  { %722 = dma.done.wait [#allocation13], 512  }
 0x206   :  { %723 = vsyncadd [#allocation13], 4294966784 }
 0x207   :  { %451 = vsyncpa [#allocation4], 1 }
 0x208   :  { %452 = vsyncpa [#allocation7], 1 }
 0x209   :  { %453 = vsyncpa [#allocation10], 1 }
 0x20a   :  { %454 = vsyncpa [#allocation5], 1 }
 0x20b   :  { %455 = vsyncpa [#allocation13], 1 }

</bundles_post_ra>
